<compile_context>
chip_gen: v5e
topology: v5e:2x2
jax: 0.10.0
libtpu: 0.0.40
codegen_flags: <defaults>
</compile_context>

<pallas_src>
import jax
import jax.numpy as jnp
from jax import lax
from jax.experimental import pallas as pl
from jax.experimental.pallas import tpu as pltpu


def _round_up(x, m):
    return (x + m - 1) // m * m


def _patch_proj_kernel(x_ref, w_ref, b_ref, o_ref):
    # x_ref: (TILE_M, K) bf16   w_ref: (K, TILE_D) bf16
    # b_ref: (1, TILE_D) f32    o_ref: (TILE_M, TILE_D) out dtype
    acc = jnp.dot(x_ref[...], w_ref[...], preferred_element_type=jnp.float32)
    o_ref[...] = (acc + b_ref[...]).astype(o_ref.dtype)


def _pick_tiles(M, K_pad, D_pad, out_bytes):
    """Pick (tile_m, tile_d, footprint) keeping the working set small."""

    def footprint(tm, td):
        return (2 * tm * K_pad * 2          # patches tile (bf16), double-buffered
                + 2 * K_pad * td * 2        # weight tile  (bf16)
                + 2 * 8 * td * 4            # bias tile    (f32, sublane-padded)
                + 2 * tm * td * out_bytes)  # output tile

    BUDGET = 20 * 1024 * 1024  # comfortable even under v7x's 64 MiB VMEM

    # Prefer a single D stripe: patches (the dominant HBM stream) are then
    # read exactly once.  Fall back to 256/128-wide D tiles only for huge D.
    if footprint(128, D_pad) <= BUDGET:
        tile_d = D_pad
    elif D_pad % 256 == 0 and footprint(128, 256) <= BUDGET:
        tile_d = 256
    else:
        tile_d = 128

    cands = [c for c in (1024, 512, 256, 128, 64, 32, 16, 8)
             if footprint(c, tile_d) <= BUDGET and c <= max(_round_up(M, 8), 8)]
    if not cands:
        cands = [8]
    tile_m = cands[-1]
    # Prefer (a) tiles that divide M (no row padding / no post-kernel slice)
    # and (b) >= 2 grid steps (keeps both v7x TensorCores busy); relax in
    # that order if impossible.
    for need_div, need_two in ((True, True), (False, True),
                               (True, False), (False, False)):
        found = None
        for c in cands:
            if need_div and M % c != 0:
                continue
            if need_two and 2 * c > M:
                continue
            found = c
            break
        if found is not None:
            tile_m = found
            break
    return tile_m, tile_d, footprint(tile_m, tile_d)


def patch_embedding(x, weight, bias, patch_size, *, out_dtype=None):
    """x: (B, C, H, W); weight: (D, C, p, p); bias: (D,).

    Returns (B, num_patches, D), matching
      Conv2d(C, D, kernel_size=p, stride=p)(x).flatten(2).transpose(1, 2).

    out_dtype defaults to x.dtype; pass jnp.bfloat16 for bf16 ViTs to halve
    the output HBM writeback (MXU accumulation is f32 either way).
    """
    B, C, H, W = x.shape
    D = weight.shape[0]
    p = patch_size
    assert H % p == 0 and W % p == 0, "img_size must be divisible by patch_size"
    nH, nW = H // p, W // p
    N = nH * nW
    K = C * p * p
    M = B * N                                   # total patch rows
    out_dtype = x.dtype if out_dtype is None else out_dtype
    out_bytes = jnp.dtype(out_dtype).itemsize

    # ---- glue (plain JAX): patch extraction + weight flatten, bf16 cast ----
    # (B, C, nH, p, nW, p) -> (B, nH, nW, C, p, p) -> (M, K); the (C, ph, pw)
    # flatten order matches Conv2d's OIHW weight reshaped to (K, D).
    # allow_input_fusion below lets XLA fuse this transpose/cast chain into
    # the kernel's input DMA so the (M, K) intermediate need not be
    # materialized as an extra HBM round trip.
    patches = x.reshape(B, C, nH, p, nW, p)
    patches = patches.transpose(0, 2, 4, 1, 3, 5).reshape(M, K)
    patches = patches.astype(jnp.bfloat16)
    w_mat = weight.reshape(D, K).T.astype(jnp.bfloat16)      # (K, D)
    b_mat = bias.reshape(1, D).astype(jnp.float32)           # (1, D)

    # ---- padding: lane-dense output dim; lane-aligned K only when K > 128 ----
    D_pad = _round_up(D, 128)
    K_pad = _round_up(K, 128) if K > 128 else K   # small K: full-dim block is fine
    tile_m, tile_d, fp = _pick_tiles(M, K_pad, D_pad, out_bytes)
    M_pad = _round_up(M, tile_m)

    if K_pad != K:
        patches = jnp.pad(patches, ((0, 0), (0, K_pad - K)))
        w_mat = jnp.pad(w_mat, ((0, K_pad - K), (0, 0)))
    if M_pad != M:
        patches = jnp.pad(patches, ((0, M_pad - M), (0, 0)))
    if D_pad != D:
        w_mat = jnp.pad(w_mat, ((0, 0), (0, D_pad - D)))
        b_mat = jnp.pad(b_mat, ((0, 0), (0, D_pad - D)))

    n_d = D_pad // tile_d   # usually 1 (single D stripe)
    n_m = M_pad // tile_m

    # D stripes on the outer axis (weight/bias block constant across the long
    # inner M loop), M tiles inner for a deep double-buffered pipeline.
    grid_spec = pltpu.PrefetchScalarGridSpec(
        num_scalar_prefetch=0,
        grid=(n_d, n_m),
        in_specs=[
            pl.BlockSpec((tile_m, K_pad), lambda j, i: (i, 0)),   # patches
            pl.BlockSpec((K_pad, tile_d), lambda j, i: (0, j)),   # weight
            pl.BlockSpec((1, tile_d), lambda j, i: (0, j)),       # bias
        ],
        out_specs=pl.BlockSpec((tile_m, tile_d), lambda j, i: (i, j)),
    )

    bytes_accessed = (n_d * M_pad * K_pad * 2        # patches (re-read per D stripe)
                      + K_pad * D_pad * 2            # weight read once
                      + 8 * D_pad * 4                # bias
                      + M_pad * D_pad * out_bytes)   # output writeback

    # VMEM limit derived from the actual double-buffered footprint + margin.
    vmem_limit = max(8 * 1024 * 1024, fp + 4 * 1024 * 1024)

    out = pl.pallas_call(
        _patch_proj_kernel,
        out_shape=jax.ShapeDtypeStruct((M_pad, D_pad), out_dtype),
        grid_spec=grid_spec,
        compiler_params=pltpu.CompilerParams(
            dimension_semantics=("parallel", "parallel"),
            vmem_limit_bytes=vmem_limit,
            allow_input_fusion=[True, False, False],
        ),
        cost_estimate=pl.CostEstimate(
            flops=2 * M * K * D,
            transcendentals=0,
            bytes_accessed=bytes_accessed,
        ),
    )(patches, w_mat, b_mat)

    # Only pay a slice pass when padding actually happened; otherwise the
    # reshape below is a free view.
    if M_pad != M or D_pad != D:
        out = out[:M, :D]
    return out.reshape(B, N, D)


def _reference(x, weight, bias, patch_size):
    # Reference via XLA conv (NCHW / OIHW), matching nn.Conv2d semantics.
    y = lax.conv_general_dilated(
        x, weight,
        window_strides=(patch_size, patch_size),
        padding="VALID",
        dimension_numbers=("NCHW", "OIHW", "NCHW"),
    ) + bias[None, :, None, None]
    B, D, nH, nW = y.shape
    return y.reshape(B, D, nH * nW).transpose(0, 2, 1)


if __name__ == "__main__":
    # Small, shape-consistent configuration.
    d_model = 32
    img_size = 16
    patch_size = 4
    n_channels = 4
    batch = 2

    key = jax.random.PRNGKey(0)
    kx, kw, kb = jax.random.split(key, 3)

    x = jax.random.normal(kx, (batch, n_channels, img_size, img_size),
                          dtype=jnp.float32)
    fan_in = n_channels * patch_size * patch_size
    scale = 1.0 / (fan_in ** 0.5)
    weight = jax.random.uniform(
        kw, (d_model, n_channels, patch_size, patch_size),
        dtype=jnp.float32, minval=-scale, maxval=scale)
    bias = jax.random.uniform(
        kb, (d_model,), dtype=jnp.float32, minval=-scale, maxval=scale)

    out = patch_embedding(x, weight, bias, patch_size)
    out = jax.block_until_ready(out)

    ref = _reference(x, weight, bias, patch_size)
    assert out.shape == ref.shape, (out.shape, ref.shape)
    # Kernel rounds patches/weight to bf16 (f32 accumulation) -> loosen tol.
    assert jnp.allclose(out, ref, atol=5e-2, rtol=5e-2), "mismatch vs reference"

    print("KERNEL_OK")
</pallas_src>

<mosaic_0001>
module attributes {stable_mosaic.version = 11 : i64} {
  func.func @_patch_proj_kernel(%arg0: i32, %arg1: i32, %arg2: memref<16x64xbf16, #tpu.memory_space<vmem>>, %arg3: memref<64x128xbf16, #tpu.memory_space<vmem>>, %arg4: memref<1x128xf32, #tpu.memory_space<vmem>>, %arg5: memref<16x128xf32, #tpu.memory_space<vmem>>) attributes {dimension_semantics = [#tpu.dimension_semantics<parallel>, #tpu.dimension_semantics<parallel>], iteration_bounds = array<i64: 1, 2>, scalar_prefetch = 0 : i64, scratch_operands = 0 : i64, tpu.core_type = #tpu.core_type<tc>, window_params = [{transform_indices = @transform_0, window_bounds = array<i64: 16, 64>}, {transform_indices = @transform_1, window_bounds = array<i64: 64, 128>}, {transform_indices = @transform_2, window_bounds = array<i64: 1, 128>}, {transform_indices = @transform_3, window_bounds = array<i64: 16, 128>}]} {
    %c0 = arith.constant 0 : index
    %c0_0 = arith.constant 0 : index
    %0 = vector.load %arg2[%c0, %c0_0] : memref<16x64xbf16, #tpu.memory_space<vmem>>, vector<16x64xbf16>
    %c0_1 = arith.constant 0 : index
    %c0_2 = arith.constant 0 : index
    %1 = vector.load %arg3[%c0_1, %c0_2] : memref<64x128xbf16, #tpu.memory_space<vmem>>, vector<64x128xbf16>
    %cst = arith.constant dense<0.000000e+00> : vector<16x128xf32>
    %2 = tpu.matmul %0, %1, %cst {dimension_numbers = #tpu.dot_dimension_numbers<[1], [0], [0], [1], [0, 0, 1, 1], [], []>} : vector<16x64xbf16>, vector<64x128xbf16>, vector<16x128xf32> -> vector<16x128xf32>
    %c0_3 = arith.constant 0 : index
    %c0_4 = arith.constant 0 : index
    %3 = vector.load %arg4[%c0_3, %c0_4] : memref<1x128xf32, #tpu.memory_space<vmem>>, vector<1x128xf32>
    %4 = vector.broadcast %3 : vector<1x128xf32> to vector<16x128xf32>
    %5 = arith.addf %2, %4 : vector<16x128xf32>
    %c0_5 = arith.constant 0 : index
    %c0_6 = arith.constant 0 : index
    %6 = vector.load %arg5[%c0_5, %c0_6] : memref<16x128xf32, #tpu.memory_space<vmem>>, vector<16x128xf32>
    tpu.vector_store %arg5[%c0_5, %c0_6], %5 {strides = array<i32>} : memref<16x128xf32, #tpu.memory_space<vmem>>, vector<16x128xf32>,
    return
  }
  func.func @transform_0(%arg0: i32, %arg1: i32) -> (i32, i32) {
    %c0_i32 = arith.constant 0 : i32
    %c0_i32_0 = arith.constant 0 : i32
    return %arg1, %c0_i32 : i32, i32
  }
  func.func @transform_1(%arg0: i32, %arg1: i32) -> (i32, i32) {
    %c0_i32 = arith.constant 0 : i32
    %c0_i32_0 = arith.constant 0 : i32
    return %c0_i32, %arg0 : i32, i32
  }
  func.func @transform_2(%arg0: i32, %arg1: i32) -> (i32, i32) {
    %c0_i32 = arith.constant 0 : i32
    %c0_i32_0 = arith.constant 0 : i32
    return %c0_i32, %arg0 : i32, i32
  }
  func.func @transform_3(%arg0: i32, %arg1: i32) -> (i32, i32) {
    %c0_i32 = arith.constant 0 : i32
    return %arg1, %arg0 : i32, i32
  }
}

</mosaic_0001>

<bundles_post_ra>
// kernel: tpu_custom_call.1
= control target key start
LH: loop header
LB: loop body
LE: loop exit
PB: predicated region body
PF: predicated region fallthrough
CT: control target
= control target key end

     0   :  { %s889_s0 = inlined_call_operand.hbm [shape: bf16[32,64], index: 0, kind: input, shape index: {}]   ;;  %s890_s1 = inlined_call_operand.hbm [shape: bf16[64,128], index: 1, kind: input, shape index: {}]   ;;  %s891_s2 = inlined_call_operand.vmem [shape: f32[1,128], index: 2, kind: input, shape index: {}]   ;;  %s892_s3 = inlined_call_operand.hbm [shape: f32[32,128], index: 3, kind: output, shape index: {}]  }
   0x1   :  { %894 = sst [smem:[#allocation11_spill]] %s890_s1 }
   0x2   :  { %8 = vsyncpa [#allocation3], 0 }
   0x3   :  { %10 = vsyncpa [#allocation3 + $0x1], 0 }
   0x4   :  { %11 = vsyncpa [#allocation6], 0 }
   0x5   :  { %12 = vsyncpa [#allocation4], 0 }
   0x6   :  { %14 = vsyncpa [#allocation4 + $0x1], 0  ;;  %s730_s12 = smov 0   ;;  %s732_s13 = smov 0  }
   0x7   :  { %s734_s14 = smov 0   ;;  %s736_s15 = smov 0  }
   0x8   :  { %s738_s16 = smov 0   ;;  %s740_s17 = smov 0  }
   0x9 LB: > { %s433_s18 = sadd.s32 4294967295, %s703_s17   ;;  %s434_s19 = sadd.s32 4294967294, %s703_s17   ;;  %s703_s17 = sphi %s740_s17, %s20_s17   ;;  %s699_s16 = sphi %s738_s16, %s908_s16   ;;  %s695_s15 = sphi %s736_s15, %s907_s15   ;;  %s691_s14 = sphi %s734_s14, %s906_s14   ;;  %s687_s13 = sphi %s732_s13, %s905_s13   ;;  %s683_s12 = sphi %s730_s12, %s904_s12  }
   0xa   : > { %p52_p0 = scmp.ne.s32.totalorder %s687_s13, %s683_s12  ;;  %p764_p1 = scmp.eq.s32.totalorder %s433_s18, 0 }
   0xb   : > { %p768_p2 = scmp.eq.s32.totalorder %s433_s18, 1  ;;  %p136_p3 = scmp.eq.s32.totalorder %s434_s19, 1 }
   0xc   : > { %p774_p4 = por %p764_p1, %p52_p0  ;;  %p435_p5 = scmp.ge.s32.totalorder %s703_s17, 1 }
   0xd   : > { %p779_p6 = por %p136_p3, %p52_p0  ;;  %p143_p7 = scmp.lt.s32.totalorder %s703_s17, 3 }
   0xe   : > { %s899_s1 = sld [smem:[#allocation11_spill]]  ;;  %s705_s28 = smov [#allocation5]  }
   0xf   : > { %p787_p8 = pnand %p435_p5, %p143_p7  ;;  %s158_s29 = sshll.u32 %s705_s28, 4  ;;  %s159_s29 = int_to_ptr.vmem [resolvable:$true] %s158_s29 }
  0x10   : > { %p438_p11 = scmp.ge.s32.totalorder %s703_s17, 2  ;;  %s893_s30 = smov 64  }
  0x11   : > { %p487_p9 = pneg %p787_p8  ;;  %s707_s4 = smov 4  }
  0x12   : > { %s29_s5 = sadd.s32 1, %s699_s16  ;;  %s39_s6 = sadd.s32 1, %s691_s14 }
  0x13   : > { %p488_p10 = pnand %p487_p9, %p764_p1  ;;  %p30_p12 = scmp.ge.s32.totalorder %s29_s5, 2 }
  0x14   : > { %s156_s26 = sshll.u32 %s899_s1, 4  ;;  %p46_p13 = scmp.ne.s32.totalorder %s691_s14, %s687_s13  ;;  %s157_s26 = int_to_ptr.hbm [resolvable:$true] %s156_s26 }
  0x15   : > { %490 = dma.hbm_to_vmem [thread:$0]  (!%p488_p10), %s157_s26, 512, %s159_s29, [#allocation6], %s893_s30, %s893_s30, %s707_s4  }
  0x16   : > { %p47_p0 = scmp.eq.s32.totalorder %s703_s17, 0  ;;  %s910_s5 = smov (%p30_p12, %s29_s5), 0 }
  0x17   : > { %p812_p5 = por %p768_p2, %p46_p13  ;;  %s36_s9 = ssub.s32 %s699_s16, %s910_s5 }
  0x18   : > { %p806_p3 = por %p47_p0, %p46_p13  ;;  %p500_p7 = scmp.lt.s32.totalorder %s703_s17, 2 }
  0x19   : > { %p37_p9 = scmp.eq.s32.totalorder %s36_s9, 0  ;;  %s178_s10 = sand.u32 1, %s691_s14  }
  0x1a   : > { %s439_s11 = sshll.u32 %s178_s10, 3  ;;  %s472_s19 = sshll.u32 %s699_s16, 3 }
  0x1b   : > { %s821_s18 = scalar_select %p37_p9, %s691_s14, %s39_s6  }
  0x1c   : > { %s187_s26 = scalar_lea.hbm %s889_s0, %s472_s19  ;;  %s182_s28 = scalar_lea.vmem [#allocation2], %s439_s11 }
  0x1d   : > { %s190_s29 = sshll.u32 %s182_s28, 4  ;;  %s188_s21 = sshll.u32 %s187_s26, 4  ;;  %s191_s29 = int_to_ptr.vmem [resolvable:$true] %s190_s29  ;;  %s189_s21 = int_to_ptr.hbm [resolvable:$true] %s188_s21 }
  0x1e   : > { %p492_p2 = pnand %p500_p7, %p806_p3  ;;  %s179_s30 = scalar_lea.sflag [#allocation3], %s178_s10 }
  0x1f   : > { %s903_s1 = smov 64   ;;  %202 = sbr.rel (%p787_p8) target bundleno = 195 (0xc3), region = 32 }
  0x20   : > { %494 = dma.hbm_to_vmem [thread:$0]  (!%p492_p2), %s189_s21, 128, %s191_s29, %s179_s30, %s903_s1, %s903_s1, %s707_s4  }
  0x21   : > { %s835_s6 = sand.u32 (!%p787_p8), 1, %s687_s13  }
  0x22   : > { %s443_s9 = sshll.u32 (!%p787_p8), %s835_s6, 3  ;;  %s205_s11 = scalar_lea.sflag (!%p787_p8), [#allocation3], %s835_s6 }
  0x23   : > { %s208_s19 = scalar_lea.vmem (!%p787_p8), [#allocation2], %s443_s9 }
  0x24   : > { %670 = dma.done.wait (%p774_p4), %s205_s11, 128  }
  0x25   : > { %672 = vsyncadd (%p774_p4), %s205_s11, 4294967168 }
  0x26   : > { %674 = dma.done.wait (%p764_p1), [#allocation6], 512  }
  0x27   : > { %676 = vsyncadd (%p764_p1), [#allocation6], 4294966784  ;;  %v477_v0 = vld [vmem:[#allocation5 + $0x18] sm:$0xff]  ;;  %v476_v1 = vld [vmem:[#allocation5 + $0x10] sm:$0xff]  ;;  %vm289_vm0 = vcmask 523264   ;;  %s445_s1 = sshll.u32 %s835_s6, 4 }
  0x28   : > { %297 = vmatpush.bf16.msra.mxu0 %v477_v0  ;;  %v475_v2 = vld [vmem:[#allocation5 + $0x8] sm:$0xff]  ;;  %v474_v3 = vld [vmem:[#allocation5] sm:$0xff]  ;;  %v473_v4 = vld [vmem:[%s208_s19] sm:$0xff]  ;;  %s478_s20 = sshll.u32 %s695_s15, 4  ;;  %s239_s10 = scalar_lea.vmem [#allocation7], %s445_s1 }
  0x29   : > { %v556_v5 = vld [vmem:[%s891_s2] ss:$0 sm:$0xff]  ;;  %s322_s7 = scalar_lea.hbm %s892_s3, %s478_s20  ;;  %s323_s24 = sshll.u32 %s239_s10, 4  ;;  %s324_s24 = int_to_ptr.vmem [resolvable:$true] %s323_s24 }
  0x2a   : > { %s325_s25 = sshll.u32 %s322_s7, 4  ;;  %s310_s26 = scalar_lea.sflag [#allocation4], %s835_s6  ;;  %s326_s25 = int_to_ptr.hbm [resolvable:$true] %s325_s25 }
  0x2b   : > { %s631_s28 = sshra.s32 %s326_s25, 4  ;;  %s637_s9 = scalar_lea.hbm %s892_s3, 32  ;;  %s632_s28 = int_to_ptr.hbm [resolvable:$true] %s631_s28 }
  0x2c   : > { %298 = vmatpush.bf16.msra.mxu0 %v476_v1  ;;  %s633_s15 = scalar_lea.hbm %s632_s28, 16  ;;  %p638_p10 = scmp.lt.s32.totalorder %s632_s28, %s892_s3 }
  0x2d   : > { %p634_p1 = scmp.ne.s32.totalorder %s632_s28, %s633_s15  ;;  %p639_p12 = scmp.lt.s32.totalorder %s637_s9, %s633_s15 }
  0x2f   : > { %p635_p4 = pnand %p634_p1, %p812_p5  ;;  %p640_p13 = por %p639_p12, %p638_p10 }
  0x30   : > { %299 = vmatpush.bf16.msra.mxu0 %v475_v2 }
  0x31   : > { %p636_p8 = pneg %p635_p4 }
  0x33   : > { %p641_p0 = pnand %p640_p13, %p636_p8 }
  0x34   : > { %300 = vmatpush.bf16.msra.mxu0 %v474_v3 }
  0x37   : > { %466 = vmatmul.msk.bf16.vlgmr.msra.gmra.mxu0 %vm289_vm0, %v473_v4 }
  0xb4   : > { %v302_v6 = vpop.f32.mrf.mxu0 }
  0xb5   : > { %v303_v7 = vadd.f32 %v556_v5, %v302_v6 }
  0xb7   : > { %307 = vst [vmem:[%s239_s10] sm:$0xff] %v303_v7 }
  0xbc   : > { %v304_v8 = vpop.f32.mrf.mxu0 }
  0xbd   : > { %v305_v9 = vadd.f32 %v556_v5, %v304_v8 }
  0xbf   : > { %308 = vst [vmem:[%s239_s10 + $0x8] sm:$0xff] %v305_v9 }
  0xc0   : > { %644 = shalt.err (!%p641_p0)
}
  0xc1   : > { %s708_s6 = smov 128   ;;  %s709_s1 = smov 8  }
  0xc2   : > { %485 = dma.vmem_to_hbm [thread:$0]  (%p812_p5), %s324_s24, 256, %s326_s25, %s310_s26, %s708_s6, %s708_s6, %s709_s1  }
  0xc3 PF: > { %s340_s22 = sand.u32 1, %s683_s12   ;;  %p496_p3 = pnand %p438_p11, %p779_p6 }
  0xc4   : > { %s341_s27 = scalar_lea.sflag [#allocation4], %s340_s22 }
  0xc5   : > { %p497_p7 = pneg %p496_p3 }
  0xc7   : > { %678 = dma.done.wait (%p497_p7), %s341_s27, 256  }
  0xc8   : > { %680 = vsyncadd (%p497_p7), %s341_s27, 4294967040  ;;  %s20_s17 = sadd.s32 1, %s703_s17   ;;  %s904_s12 = smov %s687_s13 }
  0xc9   : > { %p17_p9 = scmp.ge.s32.totalorder %s20_s17, 4   ;;  %s905_s13 = smov %s691_s14 }
  0xca   : > { %s906_s14 = smov %s821_s18  ;;  %s907_s15 = smov %s699_s16 }
  0xcb   : > { %s908_s16 = smov %s910_s5  ;;  %19 = sbr.rel (!%p17_p9) target bundleno = 9 (0x9), region = 85 }
  0xd0   :  { %347 = vsyncpa [#allocation3], 1 }
  0xd1   :  { %349 = vsyncpa [#allocation3 + $0x1], 1 }
  0xd2   :  { %350 = vsyncpa [#allocation6], 1 }
  0xd3   :  { %351 = vsyncpa [#allocation4], 1 }
  0xd4   :  { %353 = vsyncpa [#allocation4 + $0x1], 1 }

</bundles_post_ra>
